<compile_context>
chip_gen: v6e
topology: v6e:2x2x1
jax: 0.10.0
libtpu: 0.0.40
codegen_flags: <defaults>
</compile_context>

<pallas_src>
import functools

import jax
import jax.numpy as jnp
import numpy as np
from jax.experimental import pallas as pl
from jax.experimental.pallas import tpu as pltpu

_MIB = 1 << 20
_INV_SQRT2 = 0.7071067811865476
_SQRT_2_OVER_PI = 0.7978845608028654

# Flipped off once if pipeline_mode=pl.Buffered(1) is rejected by this jax/Mosaic.
_SINGLE_BUFFER_OK = [hasattr(pl, "Buffered")]


def _round_up(x, m):
    return (x + m - 1) // m * m


def _device_kind():
    try:
        return jax.devices()[0].device_kind.lower()
    except Exception:
        return ""


def _gen_caps():
    """Per-generation tile defaults and VMEM budgets."""
    kind = _device_kind()
    if "v7" in kind or "tpu7" in kind:
        # v7x: 64 MiB physical VMEM per TensorCore -> leave headroom.
        return dict(tile_m=256, tile_n=256, vmem_cap=56 * _MIB, w_resident=8 * _MIB)
    if any(("v%d" % v) in kind for v in (2, 3, 4, 5)):
        # v2..v5 class: 128-wide MXU, 128 MiB VMEM (16 MiB default scoped limit).
        return dict(tile_m=128, tile_n=256, vmem_cap=100 * _MIB, w_resident=12 * _MIB)
    # v6e class (default): 256-wide MXU, 128 MiB VMEM -> big M tiles amortize
    # per-grid-step overhead and halve output/x DMA count.
    return dict(tile_m=512, tile_n=256, vmem_cap=100 * _MIB, w_resident=16 * _MIB)


def _gelu_f32(gate, approximate):
    """GELU in f32. Exact erf (torch default) or tanh approximation (EUP slot)."""
    if approximate:
        inner = _SQRT_2_OVER_PI * (gate + 0.044715 * gate * gate * gate)
        return 0.5 * gate * (1.0 + jnp.tanh(inner))
    return 0.5 * gate * (1.0 + jax.lax.erf(gate * _INV_SQRT2))


# ---------------------------------------------------------------------------
# Kernels
# ---------------------------------------------------------------------------
def _geglu_kernel(x_ref, w_ref, b_ref, o_ref, *, tn, approximate):
    """One (tm, tn) output tile, full contraction in one MXU pass.

    x_ref: (tm, K)        token tile (matmul dtype, e.g. bf16)
    w_ref: (K, 2*tn)      packed weight tile: [ value cols | gate cols ]
    b_ref: (1, 2*tn)      packed bias tile (f32)
    o_ref: (tm, tn)
    """
    proj = jnp.dot(x_ref[...], w_ref[...], preferred_element_type=jnp.float32)
    proj = proj + b_ref[...]
    val = proj[:, :tn]
    gate = proj[:, tn:]
    o_ref[...] = (val * _gelu_f32(gate, approximate)).astype(o_ref.dtype)


def _geglu_kernel_ksplit(x_ref, w_ref, b_ref, o_ref, acc_ref, *, tn, approximate):
    """K-split variant: f32 VMEM accumulator, epilogue on the last K step.

    Grid is (.., .., n_k) with K innermost and marked "arbitrary".
    x_ref: (tm, tk)   w_ref: (tk, 2*tn)   acc_ref: (tm, 2*tn) f32 scratch.
    """
    k = pl.program_id(2)

    @pl.when(k == 0)
    def _():
        acc_ref[...] = jnp.zeros_like(acc_ref)

    acc_ref[...] += jnp.dot(x_ref[...], w_ref[...],
                            preferred_element_type=jnp.float32)

    @pl.when(k == pl.num_programs(2) - 1)
    def _():
        proj = acc_ref[...] + b_ref[...]
        val = proj[:, :tn]
        gate = proj[:, tn:]
        o_ref[...] = (val * _gelu_f32(gate, approximate)).astype(o_ref.dtype)


# ---------------------------------------------------------------------------
# Parameter packing (call once at load time)
# ---------------------------------------------------------------------------
def pack_geglu_params(weight, bias, *, tile_n=None, matmul_dtype=jnp.bfloat16):
    """Repack PyTorch nn.Linear(dim_in, 2*dim_out) params for the kernel.

    Transposes the weight, zero-pads dim_out (and, for large dim_in, the
    contraction axis) to lane/sublane-friendly sizes, interleaves value/gate
    column tiles so each grid step reads one lane-contiguous (K, 2*tn) block,
    and stores the weight in `matmul_dtype` (bf16 by default for the MXU).
    """
    two_dim_out, dim_in = weight.shape
    dim_out = two_dim_out // 2
    caps = _gen_caps()
    w_bytes = jnp.dtype(matmul_dtype).itemsize

    n_full = _round_up(dim_out, 128)
    if tile_n is None:
        # If the whole packed W stays resident in VMEM, use a single N tile
        # (n_j = 1) so x is streamed from HBM exactly once.
        if dim_in * 2 * n_full * w_bytes <= caps["w_resident"]:
            tile_n = n_full
        else:
            tile_n = caps["tile_n"]
    tn = min(_round_up(tile_n, 128), n_full)
    n_pad = _round_up(dim_out, tn)
    n_j = n_pad // tn
    padc = n_pad - dim_out

    # Pad the contraction axis to a multiple of 128 only when a K-reduction
    # grid axis could be useful; zero rows contribute nothing to the matmul.
    dim_in_pad = dim_in
    if dim_in > 1024 and dim_in % 128 != 0:
        dim_in_pad = _round_up(dim_in, 128)
    padr = dim_in_pad - dim_in

    weight = jnp.asarray(weight)
    bias = jnp.asarray(bias)

    # chunk(2, dim=-1) of (x @ W.T + b): rows [:dim_out] of W -> value half.
    wx = jnp.pad(jnp.transpose(weight[:dim_out]), ((0, padr), (0, padc)))
    wg = jnp.pad(jnp.transpose(weight[dim_out:]), ((0, padr), (0, padc)))
    w_packed = jnp.stack(
        [wx.reshape(dim_in_pad, n_j, tn), wg.reshape(dim_in_pad, n_j, tn)], axis=2
    ).reshape(dim_in_pad, n_j * 2 * tn).astype(matmul_dtype)

    bx = jnp.pad(bias[:dim_out], (0, padc)).reshape(n_j, tn)
    bg = jnp.pad(bias[dim_out:], (0, padc)).reshape(n_j, tn)
    b_packed = jnp.stack([bx, bg], axis=1).reshape(1, n_j * 2 * tn).astype(jnp.float32)

    meta = dict(dim_in=dim_in, dim_in_pad=dim_in_pad, dim_out=dim_out, tn=tn, n_j=n_j)
    return w_packed, b_packed, meta


# ---------------------------------------------------------------------------
# Forward pass
# ---------------------------------------------------------------------------
def geglu_pallas_packed(x, w_packed, b_packed, meta, *, tile_m=None, tile_k=None,
                        gelu_approximate=False):
    """GEGLU forward with pre-packed params.  x: (..., dim_in) -> (..., dim_out)."""
    dim_in = meta["dim_in"]
    K = meta["dim_in_pad"]
    dim_out = meta["dim_out"]
    tn = meta["tn"]
    n_j = meta["n_j"]
    n_pad = n_j * tn

    caps = _gen_caps()

    orig_shape = x.shape
    assert orig_shape[-1] == dim_in, "last dim of x must equal dim_in"
    M = int(np.prod(orig_shape[:-1]))

    matmul_dtype = w_packed.dtype
    out_dtype = x.dtype
    x_bytes = jnp.dtype(matmul_dtype).itemsize
    w_bytes = x_bytes
    o_bytes = jnp.dtype(out_dtype).itemsize

    # Cast once in the wrapper: halves HBM traffic + VMEM for x when bf16.
    x2 = x.reshape(M, dim_in).astype(matmul_dtype)

    # ---- tile selection & VMEM budgeting -----------------------------------
    if tile_m is None:
        tile_m = caps["tile_m"]
    tm = min(_round_up(tile_m, 16), _round_up(M, 16))

    budget = int(caps["vmem_cap"] * 0.9)

    def _need(tm_, tk_):
        # Conservative (double-buffered) per-step VMEM working set.
        n = 2 * tm_ * tk_ * x_bytes            # x blocks
        n += 2 * tk_ * 2 * tn * w_bytes        # packed-W blocks
        n += 2 * 2 * tn * 4                    # packed-bias blocks
        n += 2 * tm_ * tn * o_bytes            # output blocks
        n += tm_ * 2 * tn * 4                  # f32 proj / accumulator
        return n

    def _pick_tk(target):
        # Largest multiple-of-128 divisor of K that is <= target (>= 128).
        q = K // 128
        best = 128
        for d in range(1, q + 1):
            if q % d == 0 and 128 * d <= target:
                best = 128 * d
        return best

    if K % 128 == 0 and K > 128:
        if tile_k is not None:
            tk = _pick_tk(max(128, int(tile_k)))
        elif _need(tm, K) > budget:
            # Auto K-split: keep MXU-sized, lane-dense output tiles under the cap.
            q = K // 128
            tk = 128
            for d in range(1, q + 1):
                if q % d == 0 and _need(tm, 128 * d) <= budget:
                    tk = 128 * d
        else:
            tk = K
    else:
        tk = K

    # Last resort: shrink the M tile until the working set fits.
    while _need(tm, tk) > budget and tm > 16:
        tm = max(16, _round_up(tm // 2, 16))

    n_k = K // tk

    m_pad = _round_up(M, tm)
    n_i = m_pad // tm
    if m_pad != M or K != dim_in:
        x2 = jnp.pad(x2, ((0, m_pad - M), (0, K - dim_in)))

    vmem_limit = int(min(caps["vmem_cap"],
                         max(32 * _MIB, _need(tm, tk) * 1.25 + 2 * _MIB)))

    # Total HBM read per full pass under each loop ordering (no-split case).
    bytes_x = m_pad * K * x_bytes
    bytes_w = K * n_pad * 2 * w_bytes

    kernel_simple = functools.partial(_geglu_kernel, tn=tn, approximate=gelu_approximate)
    kernel_ksplit = functools.partial(_geglu_kernel_ksplit, tn=tn,
                                      approximate=gelu_approximate)

    def _run(allow_single_buffer):
        def spec(shape, index_map, single=False):
            if single and allow_single_buffer:
                # Resident block: one VMEM buffer is enough (no prefetch needed).
                return pl.BlockSpec(shape, index_map, pipeline_mode=pl.Buffered(1))
            return pl.BlockSpec(shape, index_map)

        if n_k > 1:
            # 3-D grid, K reduction innermost ("arbitrary") + f32 accumulator.
            if n_j >= 2:
                grid = (n_j, n_i, n_k)
                x_map = lambda j, i, k: (i, k)
                w_map = lambda j, i, k: (k, j)
                b_map = lambda j, i, k: (0, j)
                o_map = lambda j, i, k: (i, j)
            else:
                grid = (n_i, n_j, n_k)
                x_map = lambda i, j, k: (i, k)
                w_map = lambda i, j, k: (k, j)
                b_map = lambda i, j, k: (0, j)
                o_map = lambda i, j, k: (i, j)
            in_specs = [
                spec((tm, tk), x_map),
                spec((tk, 2 * tn), w_map),
                spec((1, 2 * tn), b_map, single=True),   # constant along k
            ]
            out_specs = spec((tm, tn), o_map)
            scratch = [pltpu.VMEM((tm, 2 * tn), jnp.float32)]
            kernel = kernel_ksplit
            dims = ("parallel", "parallel", "arbitrary")
        else:
            # Pick loop order to minimize HBM re-reads; M-first when it is free
            # (n_j == 1) so the larger parallel axis leads for megacore.
            j_outer = n_j > 1 and (n_j * bytes_x + bytes_w) <= (bytes_x + n_i * bytes_w)
            if j_outer:
                grid = (n_j, n_i)
                x_map = lambda j, i: (i, 0)
                w_map = lambda j, i: (0, j)
                b_map = lambda j, i: (0, j)
                o_map = lambda j, i: (i, j)
                x_single, w_single = False, n_i > 1
            else:
                grid = (n_i, n_j)
                x_map = lambda i, j: (i, 0)
                w_map = lambda i, j: (0, j)
                b_map = lambda i, j: (0, j)
                o_map = lambda i, j: (i, j)
                x_single, w_single = n_j > 1, False
            in_specs = [
                spec((tm, K), x_map, single=x_single),
                spec((K, 2 * tn), w_map, single=w_single),
                spec((1, 2 * tn), b_map, single=w_single),
            ]
            out_specs = spec((tm, tn), o_map)
            scratch = []
            kernel = kernel_simple
            dims = ("parallel", "parallel")

        return pl.pallas_call(
            kernel,
            out_shape=jax.ShapeDtypeStruct((m_pad, n_pad), out_dtype),
            grid_spec=pltpu.PrefetchScalarGridSpec(
                num_scalar_prefetch=0,
                grid=grid,
                in_specs=in_specs,
                out_specs=out_specs,
                scratch_shapes=scratch,
            ),
            compiler_params=pltpu.CompilerParams(
                dimension_semantics=dims,
                vmem_limit_bytes=vmem_limit,
            ),
        )(x2, w_packed, b_packed)

    if _SINGLE_BUFFER_OK[0]:
        try:
            out = _run(True)
        except Exception:
            _SINGLE_BUFFER_OK[0] = False   # this jax rejects Buffered(1): fall back
            out = _run(False)
    else:
        out = _run(False)

    out = out[:M, :dim_out]
    return out.reshape(*orig_shape[:-1], dim_out)


def geglu_pallas(x, weight, bias, *, tile_m=None, tile_n=None, tile_k=None,
                 matmul_dtype=jnp.bfloat16, gelu_approximate=False):
    """Convenience wrapper: packs params then runs the kernel.

    For repeated forward passes call pack_geglu_params() once and reuse.
    x:      (..., dim_in)
    weight: (2*dim_out, dim_in)   -- PyTorch nn.Linear layout
    bias:   (2*dim_out,)
    """
    w_packed, b_packed, meta = pack_geglu_params(
        weight, bias, tile_n=tile_n, matmul_dtype=matmul_dtype)
    return geglu_pallas_packed(x, w_packed, b_packed, meta, tile_m=tile_m,
                               tile_k=tile_k, gelu_approximate=gelu_approximate)


def geglu_reference(x, weight, bias):
    dim_out = weight.shape[0] // 2
    proj = jnp.einsum("...i,oi->...o", x, weight,
                      precision=jax.lax.Precision.HIGHEST) + bias
    val, gate = proj[..., :dim_out], proj[..., dim_out:]
    gelu = 0.5 * gate * (1.0 + jax.lax.erf(gate / jnp.sqrt(2.0)))
    return val * gelu


if __name__ == "__main__":
    # Small shapes consistent with the module: x is (batch, seq, dim_in).
    batch, seq, dim_in = 2, 8, 32
    dim_out = dim_in  # dim_out defaults to dim_in in the module

    key = jax.random.PRNGKey(0)
    kx, kw, kb, kx2, kw2, kb2 = jax.random.split(key, 6)

    x = jax.random.normal(kx, (batch, seq, dim_in), dtype=jnp.float32)
    bound = 1.0 / np.sqrt(dim_in)
    weight = jax.random.uniform(kw, (dim_out * 2, dim_in),
                                minval=-bound, maxval=bound, dtype=jnp.float32)
    bias = jax.random.uniform(kb, (dim_out * 2,),
                              minval=-bound, maxval=bound, dtype=jnp.float32)
    ref = geglu_reference(x, weight, bias)

    # 1) Default path: bf16 MXU inputs, f32 accumulation/epilogue.
    w_packed, b_packed, meta = pack_geglu_params(weight, bias)
    out = jax.block_until_ready(geglu_pallas_packed(x, w_packed, b_packed, meta))
    np.testing.assert_allclose(np.asarray(out), np.asarray(ref), rtol=2e-2, atol=2e-2)

    # 2) Bit-faithful f32 path (matches the torch f32 Linear closely).
    out32 = jax.block_until_ready(
        geglu_pallas(x, weight, bias, matmul_dtype=jnp.float32))
    np.testing.assert_allclose(np.asarray(out32), np.asarray(ref), rtol=1e-5, atol=1e-5)

    # 3) Exercise the K-reduction grid axis (forced small tile_k) at a modest size.
    M2, d_in2, d_out2 = 256, 512, 256
    x2 = jax.random.normal(kx2, (M2, d_in2), dtype=jnp.float32)
    bound2 = 1.0 / np.sqrt(d_in2)
    w2 = jax.random.uniform(kw2, (d_out2 * 2, d_in2),
                            minval=-bound2, maxval=bound2, dtype=jnp.float32)
    b2 = jax.random.uniform(kb2, (d_out2 * 2,),
                            minval=-bound2, maxval=bound2, dtype=jnp.float32)
    outk = jax.block_until_ready(geglu_pallas(x2, w2, b2, tile_k=128))
    refk = geglu_reference(x2, w2, b2)
    np.testing.assert_allclose(np.asarray(outk), np.asarray(refk), rtol=5e-2, atol=5e-2)

    print("KERNEL_OK")
</pallas_src>

<mosaic_0001>
module attributes {stable_mosaic.version = 11 : i64} {
  func.func @_geglu_kernel(%arg0: i32, %arg1: i32, %arg2: memref<16x32xbf16, #tpu.memory_space<vmem>>, %arg3: memref<32x256xbf16, #tpu.memory_space<vmem>>, %arg4: memref<1x256xf32, #tpu.memory_space<vmem>>, %arg5: memref<16x128xf32, #tpu.memory_space<vmem>>) attributes {dimension_semantics = [#tpu.dimension_semantics<parallel>, #tpu.dimension_semantics<parallel>], iteration_bounds = array<i64: 1, 1>, scalar_prefetch = 0 : i64, scratch_operands = 0 : i64, tpu.core_type = #tpu.core_type<tc>, window_params = [{transform_indices = @transform_0, window_bounds = array<i64: 16, 32>}, {transform_indices = @transform_1, window_bounds = array<i64: 32, 256>}, {transform_indices = @transform_2, window_bounds = array<i64: 1, 256>}, {transform_indices = @transform_3, window_bounds = array<i64: 16, 128>}]} {
    %c0 = arith.constant 0 : index
    %c0_0 = arith.constant 0 : index
    %0 = vector.load %arg2[%c0, %c0_0] : memref<16x32xbf16, #tpu.memory_space<vmem>>, vector<16x32xbf16>
    %c0_1 = arith.constant 0 : index
    %c0_2 = arith.constant 0 : index
    %1 = vector.load %arg3[%c0_1, %c0_2] : memref<32x256xbf16, #tpu.memory_space<vmem>>, vector<32x256xbf16>
    %cst = arith.constant dense<0.000000e+00> : vector<16x256xf32>
    %2 = tpu.matmul %0, %1, %cst {dimension_numbers = #tpu.dot_dimension_numbers<[1], [0], [0], [1], [0, 0, 1, 1], [], []>} : vector<16x32xbf16>, vector<32x256xbf16>, vector<16x256xf32> -> vector<16x256xf32>
    %c0_3 = arith.constant 0 : index
    %c0_4 = arith.constant 0 : index
    %3 = vector.load %arg4[%c0_3, %c0_4] : memref<1x256xf32, #tpu.memory_space<vmem>>, vector<1x256xf32>
    %4 = vector.broadcast %3 : vector<1x256xf32> to vector<16x256xf32>
    %5 = arith.addf %2, %4 : vector<16x256xf32>
    %6 = vector.extract_strided_slice %5 {offsets = [0, 0], sizes = [16, 128], strides = [1, 1]} : vector<16x256xf32> to vector<16x128xf32>
    %7 = vector.extract_strided_slice %5 {offsets = [0, 128], sizes = [16, 128], strides = [1, 1]} : vector<16x256xf32> to vector<16x128xf32>
    %cst_5 = arith.constant 5.000000e-01 : f32
    %8 = vector.broadcast %cst_5 : f32 to vector<16x128xf32>
    %9 = arith.mulf %8, %7 : vector<16x128xf32>
    %cst_6 = arith.constant 0.707106769 : f32
    %10 = vector.broadcast %cst_6 : f32 to vector<16x128xf32>
    %11 = arith.mulf %7, %10 : vector<16x128xf32>
    %12 = math.erf %11 : vector<16x128xf32>
    %cst_7 = arith.constant 1.000000e+00 : f32
    %13 = vector.broadcast %cst_7 : f32 to vector<16x128xf32>
    %14 = arith.addf %13, %12 : vector<16x128xf32>
    %15 = arith.mulf %9, %14 : vector<16x128xf32>
    %16 = arith.mulf %6, %15 : vector<16x128xf32>
    %c0_8 = arith.constant 0 : index
    %c0_9 = arith.constant 0 : index
    %17 = vector.load %arg5[%c0_8, %c0_9] : memref<16x128xf32, #tpu.memory_space<vmem>>, vector<16x128xf32>
    tpu.vector_store %arg5[%c0_8, %c0_9], %16 {strides = array<i32>} : memref<16x128xf32, #tpu.memory_space<vmem>>, vector<16x128xf32>,
    return
  }
  func.func @transform_0(%arg0: i32, %arg1: i32) -> (i32, i32) {
    %c0_i32 = arith.constant 0 : i32
    %c0_i32_0 = arith.constant 0 : i32
    return %arg0, %c0_i32 : i32, i32
  }
  func.func @transform_1(%arg0: i32, %arg1: i32) -> (i32, i32) {
    %c0_i32 = arith.constant 0 : i32
    %c0_i32_0 = arith.constant 0 : i32
    return %c0_i32, %arg1 : i32, i32
  }
  func.func @transform_2(%arg0: i32, %arg1: i32) -> (i32, i32) {
    %c0_i32 = arith.constant 0 : i32
    %c0_i32_0 = arith.constant 0 : i32
    return %c0_i32, %arg1 : i32, i32
  }
  func.func @transform_3(%arg0: i32, %arg1: i32) -> (i32, i32) {
    %c0_i32 = arith.constant 0 : i32
    return %arg0, %arg1 : i32, i32
  }
}

module attributes {stable_mosaic.version = 11 : i64} {
  func.func @_geglu_kernel(%arg0: i32, %arg1: i32, %arg2: memref<16x32xbf16, #tpu.memory_space<vmem>>, %arg3: memref<32x256xbf16, #tpu.memory_space<vmem>>, %arg4: memref<1x256xf32, #tpu.memory_space<vmem>>, %arg5: memref<16x128xf32, #tpu.memory_space<vmem>>) attributes {dimension_semantics = [#tpu.dimension_semantics<parallel>, #tpu.dimension_semantics<parallel>], iteration_bounds = array<i64: 1, 1>, scalar_prefetch = 0 : i64, scratch_operands = 0 : i64, tpu.core_type = #tpu.core_type<tc>, window_params = [{transform_indices = @transform_0, window_bounds = array<i64: 16, 32>}, {transform_indices = @transform_1, window_bounds = array<i64: 32, 256>}, {transform_indices = @transform_2, window_bounds = array<i64: 1, 256>}, {transform_indices = @transform_3, window_bounds = array<i64: 16, 128>}]} {
    %c0 = arith.constant 0 : index
    %c0_0 = arith.constant 0 : index
    %0 = vector.load %arg2[%c0, %c0_0] : memref<16x32xbf16, #tpu.memory_space<vmem>>, vector<16x32xbf16>
    %c0_1 = arith.constant 0 : index
    %c0_2 = arith.constant 0 : index
    %1 = vector.load %arg3[%c0_1, %c0_2] : memref<32x256xbf16, #tpu.memory_space<vmem>>, vector<32x256xbf16>
    %cst = arith.constant dense<0.000000e+00> : vector<16x256xf32>
    %2 = tpu.matmul %0, %1, %cst {dimension_numbers = #tpu.dot_dimension_numbers<[1], [0], [0], [1], [0, 0, 1, 1], [], []>} : vector<16x32xbf16>, vector<32x256xbf16>, vector<16x256xf32> -> vector<16x256xf32>
    %c0_3 = arith.constant 0 : index
    %c0_4 = arith.constant 0 : index
    %3 = vector.load %arg4[%c0_3, %c0_4] : memref<1x256xf32, #tpu.memory_space<vmem>>, vector<1x256xf32>
    %4 = vector.broadcast %3 : vector<1x256xf32> to vector<16x256xf32>
    %5 = arith.addf %2, %4 : vector<16x256xf32>
    %6 = vector.extract_strided_slice %5 {offsets = [0, 0], sizes = [16, 128], strides = [1, 1]} : vector<16x256xf32> to vector<16x128xf32>
    %7 = vector.extract_strided_slice %5 {offsets = [0, 128], sizes = [16, 128], strides = [1, 1]} : vector<16x256xf32> to vector<16x128xf32>
    %cst_5 = arith.constant 5.000000e-01 : f32
    %8 = vector.broadcast %cst_5 : f32 to vector<16x128xf32>
    %9 = arith.mulf %8, %7 : vector<16x128xf32>
    %cst_6 = arith.constant 0.707106769 : f32
    %10 = vector.broadcast %cst_6 : f32 to vector<16x128xf32>
    %11 = arith.mulf %7, %10 : vector<16x128xf32>
    %12 = math.erf %11 : vector<16x128xf32>
    %cst_7 = arith.constant 1.000000e+00 : f32
    %13 = vector.broadcast %cst_7 : f32 to vector<16x128xf32>
    %14 = arith.addf %13, %12 : vector<16x128xf32>
    %15 = arith.mulf %9, %14 : vector<16x128xf32>
    %16 = arith.mulf %6, %15 : vector<16x128xf32>
    %c0_8 = arith.constant 0 : index
    %c0_9 = arith.constant 0 : index
    %17 = vector.load %arg5[%c0_8, %c0_9] : memref<16x128xf32, #tpu.memory_space<vmem>>, vector<16x128xf32>
    tpu.vector_store %arg5[%c0_8, %c0_9], %16 {strides = array<i32>} : memref<16x128xf32, #tpu.memory_space<vmem>>, vector<16x128xf32>,
    return
  }
  func.func @transform_0(%arg0: i32, %arg1: i32) -> (i32, i32) {
    %c0_i32 = arith.constant 0 : i32
    %c0_i32_0 = arith.constant 0 : i32
    return %arg0, %c0_i32 : i32, i32
  }
  func.func @transform_1(%arg0: i32, %arg1: i32) -> (i32, i32) {
    %c0_i32 = arith.constant 0 : i32
    %c0_i32_0 = arith.constant 0 : i32
    return %c0_i32, %arg1 : i32, i32
  }
  func.func @transform_2(%arg0: i32, %arg1: i32) -> (i32, i32) {
    %c0_i32 = arith.constant 0 : i32
    %c0_i32_0 = arith.constant 0 : i32
    return %c0_i32, %arg1 : i32, i32
  }
  func.func @transform_3(%arg0: i32, %arg1: i32) -> (i32, i32) {
    %c0_i32 = arith.constant 0 : i32
    return %arg0, %arg1 : i32, i32
  }
}

</mosaic_0001>

<bundles_post_ra>
// kernel: tpu_custom_call.1
= control target key start
LH: loop header
LB: loop body
LE: loop exit
PB: predicated region body
PF: predicated region fallthrough
CT: control target
= control target key end

     0   :  { %8 = vsyncpa [#allocation3], 0  ;;  %s303_s0 = inlined_call_operand.hbm [shape: bf16[16,32], index: 0, kind: input, shape index: {}]   ;;  %s304_s1 = inlined_call_operand.hbm [shape: bf16[32,256], index: 1, kind: input, shape index: {}]   ;;  %s305_s2 = inlined_call_operand.vmem [shape: f32[1,256], index: 2, kind: input, shape index: {}]   ;;  %s306_s3 = inlined_call_operand.hbm [shape: f32[16,128], index: 3, kind: output, shape index: {}]  }
   0x1   :  { %9 = vsyncpa [#allocation6], 0 }
   0x2   :  { %10 = vsyncpa [#allocation4], 0  ;;  %s257_s12 = smov [#allocation2]  }
   0x3   :  { %s16_s13 = sshll.u32 %s257_s12, 4  ;;  %s17_s13 = int_to_ptr.vmem [resolvable:$true] %s16_s13 }
   0x4   :  { %s199_s14 = scalar_lea.vmem %s17_s13, 128  ;;  %p204_p1 = scmp.lt.s32.totalorder %s17_s13, %s17_s13 }
   0x5   :  { %p200_p0 = scmp.ne.s32.totalorder %s17_s13, %s199_s14  ;;  %p205_p2 = scmp.lt.s32.totalorder %s199_s14, %s199_s14 }
   0x7   :  { %p206_p3 = por %p205_p2, %p204_p1 }
   0x9   :  { %p207_p4 = pnand %p206_p3, %p200_p0 }
   0xb   :  { %210 = shalt.err (!%p207_p4)
}
   0xc   :  { %s258_s15 = smov 64   ;;  %s259_s16 = smov 4  }
   0xd   :  { %22 = dma.hbm_to_vmem [thread:$0]  %s303_s0, 128, %s17_s13, [#allocation3], %s258_s15, %s258_s15, %s259_s16  }
   0xe   :  { %s260_s19 = smov [#allocation5]  }
   0xf   :  { %s28_s20 = sshll.u32 %s260_s19, 4  ;;  %s29_s20 = int_to_ptr.vmem [resolvable:$true] %s28_s20 }
  0x10   :  { %s219_s21 = scalar_lea.vmem %s29_s20, 512  ;;  %p224_p6 = scmp.lt.s32.totalorder %s29_s20, %s29_s20 }
  0x11   :  { %p220_p5 = scmp.ne.s32.totalorder %s29_s20, %s219_s21  ;;  %p225_p7 = scmp.lt.s32.totalorder %s219_s21, %s219_s21 }
  0x13   :  { %p226_p8 = por %p225_p7, %p224_p6 }
  0x15   :  { %p227_p9 = pnand %p226_p8, %p220_p5 }
  0x17   :  { %230 = shalt.err (!%p227_p9)
}
  0x18   :  { %s261_s22 = smov 128   ;;  %s262_s23 = smov 8  }
  0x19   :  { %34 = dma.hbm_to_vmem [thread:$0]  %s304_s1, 512, %s29_s20, [#allocation6], %s261_s22, %s261_s22, %s262_s23  }
  0x1a   :  { %251 = dma.done.wait [#allocation3], 128  }
  0x1b   :  { %252 = vsyncadd [#allocation3], 4294967168 }
  0x1c   :  { %253 = dma.done.wait [#allocation6], 512  }
  0x1d   :  { %254 = vsyncadd [#allocation6], 4294966784  ;;  %v263_v0 = vmov 0   ;;  %v180_v1 = vld [vmem:[#allocation5 + $0x14] ss:$8 sps:$4 sm:$0xff]   ;;  %vm87_vm0 = vcmask 261120   ;;  %v52_v6 = vlaneseq }
  0x1e   :  { %123 = vmatprep.mubr.bf16.mxu0 %v263_v0  ;;  %v182_v2 = vld [vmem:[#allocation5 + $0x10] ss:$8 sps:$4 sm:$0xff]   ;;  %103 = vmatprep.subr.bf16.mxu0 %v180_v1  ;;  %v183_v3 = vld [vmem:[#allocation5 + $0x4] ss:$8 sps:$4 sm:$0xff]   ;;  %v185_v4 = vld [vmem:[#allocation5] ss:$8 sps:$4 sm:$0xff]  }
  0x1f   :  { %104 = vmatpush1.bf16.msra.mxu0 %v182_v2  ;;  %v186_v5 = vld [vmem:[#allocation2] sm:$0xff]   ;;  %v53_v7 = vshrl.u32 %v52_v6, 7 }
  0x20   :  { %105 = vmatprep.subr.bf16.mxu0 %v183_v3  ;;  %v50_v9 = vld [vmem:[%s305_s2] sm:$0x3]  ;;  %s264_s2 = smov [#allocation7]  }
  0x21   :  { %v58_v8 = vsub.s32 1, %v53_v7  ;;  %v54_v19 = vsub.s32 0, %v53_v7  ;;  %s153_s26 = sshll.u32 %s264_s2, 4  ;;  %s154_s26 = int_to_ptr.vmem [resolvable:$true] %s153_s26 }
  0x22   :  { %s231_s27 = scalar_lea.vmem %s154_s26, 256  ;;  %p236_p11 = scmp.lt.s32.totalorder %s154_s26, %s154_s26 }
  0x23   :  { %106 = vmatpush1.bf16.msra.mxu0 %v185_v4  ;;  %v59_v10 = vrot.slane %v50_v9, %v58_v8  ;;  %v55_v20 = vrot.slane %v50_v9, %v54_v19  ;;  %p232_p10 = scmp.ne.s32.totalorder %s154_s26, %s231_s27  ;;  %p237_p12 = scmp.lt.s32.totalorder %s231_s27, %s231_s27 }
  0x25   :  { %p238_p13 = por %p237_p12, %p236_p11 }
  0x26   :  { %171 = vmatmul.mubr.msk.bf16.vlgmr.msra.gmra.mxu0 %vm87_vm0, %v186_v5 }
  0x27   :  { %p239_p0 = pnand %p238_p13, %p232_p10 }
  0xe6   :  { %v125_v11 = vpop.f32.mrf.mxu0 }
  0xe7   :  { %v126_v24 = vadd.f32 %v125_v11, %v55_v20 }
  0xe8   :  { %v127_v12 = vpop.f32.mrf.mxu0 }
  0xe9   :  { %v128_v13 = vadd.f32 %v127_v12, %v59_v10 }
  0xea   :  { %v129_v14 = vpop.f32.mrf.mxu0 }
  0xeb   :  { %v136_v15 = vmul.f32 0.70710677, %v128_v13  ;;  %v134_v22 = vmul.f32 0.5, %v128_v13  ;;  %v130_v30 = vadd.f32 %v129_v14, %v55_v20 }
  0xec   :  { %v131_v16 = vpop.f32.mrf.mxu0 }
  0xed   :  { %187 = verf.f32 %v136_v15  ;;  %v132_v17 = vadd.f32 %v131_v16, %v59_v10 }
  0xef   :  { %v137_v18 = vmul.f32 0.70710677, %v132_v17  ;;  %v135_v27 = vmul.f32 0.5, %v132_v17 }
  0xf1   :  { %189 = verf.f32 %v137_v18 }
  0xfa   :  { %v188_v21 = vpop.eup %187 }
  0xfb   :  { %v140_v23 = vadd.f32 1.0, %v188_v21 }
  0xfd   :  { %v142_v25 = vmul.f32 %v140_v23, %v134_v22 }
  0xfe   :  { %v190_v26 = vpop.eup %189 }
  0xff   :  { %v141_v28 = vadd.f32 1.0, %v190_v26  ;;  %v144_v29 = vmul.f32 %v142_v25, %v126_v24 }
 0x101   :  { %v143_v31 = vmul.f32 %v141_v28, %v135_v27  ;;  %146 = vst [vmem:[#allocation7] sm:$0xff] %v144_v29 }
 0x103   :  { %v145_v32 = vmul.f32 %v143_v31, %v130_v30 }
 0x105   :  { %147 = vst [vmem:[#allocation7 + $0x8] sm:$0xff] %v145_v32 }
 0x106   :  { %242 = shalt.err (!%p239_p0)
}
 0x107   :  { %159 = dma.vmem_to_hbm [thread:$0]  %s154_s26, 256, %s306_s3, [#allocation4], %s261_s22, %s261_s22, %s262_s23  }
 0x108   :  { %255 = dma.done.wait [#allocation4], 256  }
 0x109   :  { %256 = vsyncadd [#allocation4], 4294967040 }
 0x10a   :  { %163 = vsyncpa [#allocation3], 1 }
 0x10b   :  { %164 = vsyncpa [#allocation6], 1 }
 0x10c   :  { %165 = vsyncpa [#allocation4], 1 }

// kernel: tpu_custom_call.1
= control target key start
LH: loop header
LB: loop body
LE: loop exit
PB: predicated region body
PF: predicated region fallthrough
CT: control target
= control target key end

     0   :  { %8 = vsyncpa [#allocation3], 0  ;;  %s303_s0 = inlined_call_operand.hbm [shape: bf16[16,32], index: 0, kind: input, shape index: {}]   ;;  %s304_s1 = inlined_call_operand.hbm [shape: bf16[32,256], index: 1, kind: input, shape index: {}]   ;;  %s305_s2 = inlined_call_operand.vmem [shape: f32[1,256], index: 2, kind: input, shape index: {}]   ;;  %s306_s3 = inlined_call_operand.hbm [shape: f32[16,128], index: 3, kind: output, shape index: {}]  }
   0x1   :  { %9 = vsyncpa [#allocation6], 0 }
   0x2   :  { %10 = vsyncpa [#allocation4], 0  ;;  %s257_s12 = smov [#allocation2]  }
   0x3   :  { %s16_s13 = sshll.u32 %s257_s12, 4  ;;  %s17_s13 = int_to_ptr.vmem [resolvable:$true] %s16_s13 }
   0x4   :  { %s199_s14 = scalar_lea.vmem %s17_s13, 128  ;;  %p204_p1 = scmp.lt.s32.totalorder %s17_s13, %s17_s13 }
   0x5   :  { %p200_p0 = scmp.ne.s32.totalorder %s17_s13, %s199_s14  ;;  %p205_p2 = scmp.lt.s32.totalorder %s199_s14, %s199_s14 }
   0x7   :  { %p206_p3 = por %p205_p2, %p204_p1 }
   0x9   :  { %p207_p4 = pnand %p206_p3, %p200_p0 }
   0xb   :  { %210 = shalt.err (!%p207_p4)
}
   0xc   :  { %s258_s15 = smov 64   ;;  %s259_s16 = smov 4  }
   0xd   :  { %22 = dma.hbm_to_vmem [thread:$0]  %s303_s0, 128, %s17_s13, [#allocation3], %s258_s15, %s258_s15, %s259_s16  }
   0xe   :  { %s260_s19 = smov [#allocation5]  }
   0xf   :  { %s28_s20 = sshll.u32 %s260_s19, 4  ;;  %s29_s20 = int_to_ptr.vmem [resolvable:$true] %s28_s20 }
  0x10   :  { %s219_s21 = scalar_lea.vmem %s29_s20, 512  ;;  %p224_p6 = scmp.lt.s32.totalorder %s29_s20, %s29_s20 }
  0x11   :  { %p220_p5 = scmp.ne.s32.totalorder %s29_s20, %s219_s21  ;;  %p225_p7 = scmp.lt.s32.totalorder %s219_s21, %s219_s21 }
  0x13   :  { %p226_p8 = por %p225_p7, %p224_p6 }
  0x15   :  { %p227_p9 = pnand %p226_p8, %p220_p5 }
  0x17   :  { %230 = shalt.err (!%p227_p9)
}
  0x18   :  { %s261_s22 = smov 128   ;;  %s262_s23 = smov 8  }
  0x19   :  { %34 = dma.hbm_to_vmem [thread:$0]  %s304_s1, 512, %s29_s20, [#allocation6], %s261_s22, %s261_s22, %s262_s23  }
  0x1a   :  { %251 = dma.done.wait [#allocation3], 128  }
  0x1b   :  { %252 = vsyncadd [#allocation3], 4294967168 }
  0x1c   :  { %253 = dma.done.wait [#allocation6], 512  }
  0x1d   :  { %254 = vsyncadd [#allocation6], 4294966784  ;;  %v263_v0 = vmov 0   ;;  %v180_v1 = vld [vmem:[#allocation5 + $0x14] ss:$8 sps:$4 sm:$0xff]   ;;  %vm87_vm0 = vcmask 261120   ;;  %v52_v6 = vlaneseq }
  0x1e   :  { %123 = vmatprep.mubr.bf16.mxu0 %v263_v0  ;;  %v182_v2 = vld [vmem:[#allocation5 + $0x10] ss:$8 sps:$4 sm:$0xff]   ;;  %103 = vmatprep.subr.bf16.mxu0 %v180_v1  ;;  %v183_v3 = vld [vmem:[#allocation5 + $0x4] ss:$8 sps:$4 sm:$0xff]   ;;  %v185_v4 = vld [vmem:[#allocation5] ss:$8 sps:$4 sm:$0xff]  }
  0x1f   :  { %104 = vmatpush1.bf16.msra.mxu0 %v182_v2  ;;  %v186_v5 = vld [vmem:[#allocation2] sm:$0xff]   ;;  %v53_v7 = vshrl.u32 %v52_v6, 7 }
  0x20   :  { %105 = vmatprep.subr.bf16.mxu0 %v183_v3  ;;  %v50_v9 = vld [vmem:[%s305_s2] sm:$0x3]  ;;  %s264_s2 = smov [#allocation7]  }
  0x21   :  { %v58_v8 = vsub.s32 1, %v53_v7  ;;  %v54_v19 = vsub.s32 0, %v53_v7  ;;  %s153_s26 = sshll.u32 %s264_s2, 4  ;;  %s154_s26 = int_to_ptr.vmem [resolvable:$true] %s153_s26 }
  0x22   :  { %s231_s27 = scalar_lea.vmem %s154_s26, 256  ;;  %p236_p11 = scmp.lt.s32.totalorder %s154_s26, %s154_s26 }
  0x23   :  { %106 = vmatpush1.bf16.msra.mxu0 %v185_v4  ;;  %v59_v10 = vrot.slane %v50_v9, %v58_v8  ;;  %v55_v20 = vrot.slane %v50_v9, %v54_v19  ;;  %p232_p10 = scmp.ne.s32.totalorder %s154_s26, %s231_s27  ;;  %p237_p12 = scmp.lt.s32.totalorder %s231_s27, %s231_s27 }
  0x25   :  { %p238_p13 = por %p237_p12, %p236_p11 }
  0x26   :  { %171 = vmatmul.mubr.msk.bf16.vlgmr.msra.gmra.mxu0 %vm87_vm0, %v186_v5 }
  0x27   :  { %p239_p0 = pnand %p238_p13, %p232_p10 }
  0xe6   :  { %v125_v11 = vpop.f32.mrf.mxu0 }
  0xe7   :  { %v126_v24 = vadd.f32 %v125_v11, %v55_v20 }
  0xe8   :  { %v127_v12 = vpop.f32.mrf.mxu0 }
  0xe9   :  { %v128_v13 = vadd.f32 %v127_v12, %v59_v10 }
  0xea   :  { %v129_v14 = vpop.f32.mrf.mxu0 }
  0xeb   :  { %v136_v15 = vmul.f32 0.70710677, %v128_v13  ;;  %v134_v22 = vmul.f32 0.5, %v128_v13  ;;  %v130_v30 = vadd.f32 %v129_v14, %v55_v20 }
  0xec   :  { %v131_v16 = vpop.f32.mrf.mxu0 }
  0xed   :  { %187 = verf.f32 %v136_v15  ;;  %v132_v17 = vadd.f32 %v131_v16, %v59_v10 }
  0xef   :  { %v137_v18 = vmul.f32 0.70710677, %v132_v17  ;;  %v135_v27 = vmul.f32 0.5, %v132_v17 }
  0xf1   :  { %189 = verf.f32 %v137_v18 }
  0xfa   :  { %v188_v21 = vpop.eup %187 }
  0xfb   :  { %v140_v23 = vadd.f32 1.0, %v188_v21 }
  0xfd   :  { %v142_v25 = vmul.f32 %v140_v23, %v134_v22 }
  0xfe   :  { %v190_v26 = vpop.eup %189 }
  0xff   :  { %v141_v28 = vadd.f32 1.0, %v190_v26  ;;  %v144_v29 = vmul.f32 %v142_v25, %v126_v24 }
 0x101   :  { %v143_v31 = vmul.f32 %v141_v28, %v135_v27  ;;  %146 = vst [vmem:[#allocation7] sm:$0xff] %v144_v29 }
 0x103   :  { %v145_v32 = vmul.f32 %v143_v31, %v130_v30 }
 0x105   :  { %147 = vst [vmem:[#allocation7 + $0x8] sm:$0xff] %v145_v32 }
 0x106   :  { %242 = shalt.err (!%p239_p0)
}
 0x107   :  { %159 = dma.vmem_to_hbm [thread:$0]  %s154_s26, 256, %s306_s3, [#allocation4], %s261_s22, %s261_s22, %s262_s23  }
 0x108   :  { %255 = dma.done.wait [#allocation4], 256  }
 0x109   :  { %256 = vsyncadd [#allocation4], 4294967040 }
 0x10a   :  { %163 = vsyncpa [#allocation3], 1 }
 0x10b   :  { %164 = vsyncpa [#allocation6], 1 }
 0x10c   :  { %165 = vsyncpa [#allocation4], 1 }

</bundles_post_ra>
